<compile_context>
chip_gen: v6e
topology: v6e:2x2x1
jax: 0.10.0
libtpu: 0.0.40
codegen_flags: <defaults>
</compile_context>

<pallas_src>
import math

import jax
import jax.numpy as jnp
from jax.experimental import pallas as pl
from jax.experimental.pallas import tpu as pltpu


LANE_CANDIDATES = (512, 256, 128)   # prefer a lane width that divides n exactly
WIDE_LANES = 512
NARROW_LANES = 128


def _amplitude_kernel(x_ref, o_ref):
    # x_ref: (2, block_rows, lanes) -- plane 0 = real, plane 1 = imag.
    re = x_ref[0]
    im = x_ref[1]
    # |re^2 - im^2| exactly as the PyTorch module computes it (input dtype).
    o_ref[...] = jnp.abs(re * re - im * im)


def _max_block_rows():
    """Per-generation row-block cap.

    v7x (~3.2 TB/s HBM per TC): 4 MiB blocks keep the ~0.35 us per-grid-step
    overhead <10% of step time.  v5e/v6e: 1024 rows (2 MiB per operand block,
    12 MiB double-buffered) stays under v5e's 16 MiB default scoped VMEM
    without any vmem_limit_bytes flag.
    """
    try:
        kind = jax.devices()[0].device_kind.lower()
    except Exception:
        kind = ""
    if "v7" in kind or "tpu7" in kind or "7x" in kind:
        return 2048
    return 1024


def _pick_layout(n, max_block_rows):
    """Choose (lanes, rows, block_rows) for a flat length n."""
    # Lane width: prefer one that divides n exactly -> no pad on the input and
    # no un-pad copy over the Pallas output.
    lanes = None
    for cand in LANE_CANDIDATES:
        if n >= cand and n % cand == 0:
            lanes = cand
            break
    if lanes is None:
        lanes = WIDE_LANES if n >= 8 * WIDE_LANES else NARROW_LANES
    rows = pl.cdiv(n, lanes)

    # Row block: biggest that fits the VMEM budget, but never so big that the
    # grid collapses to a single step (the lone "parallel" axis needs >= 2
    # steps to shard across v7x's two TensorCores).  Ragged last blocks are
    # handled by Pallas boundary masking (cdiv grid), not by padding rows.
    if rows <= 8:
        block_rows = rows                       # tiny input: one (full) block
    else:
        block_rows = min(max_block_rows, rows)
        if block_rows >= rows:                  # grid would collapse to 1 step
            block_rows = pl.cdiv(rows, 2)
        block_rows = min(pl.cdiv(block_rows, 8) * 8, rows)  # sublane multiple
    return lanes, rows, block_rows


def amplitude(x):
    """Pallas equivalent of Amplitude.forward. x has shape [..., 2]."""
    assert x.shape[-1] == 2, "Tensor needs real and imag in the last rank..."
    out_shape = x.shape[:-1]
    dtype = x.dtype
    n = math.prod(out_shape)

    lanes, rows, block_rows = _pick_layout(n, _max_block_rows())
    n_pad = rows * lanes

    # ONE fused pre-pass: deinterleave (real, imag) via a single transpose.
    # Feeding a single 3-D operand (instead of two separately materialized
    # re/im buffers) removes a duplicate HBM round trip and halves the input
    # DMA descriptors per grid step.
    xt = jnp.transpose(x.reshape(n, 2))          # (2, n): plane 0 = re, 1 = im
    if n_pad != n:                               # ragged tail only
        xt = jnp.pad(xt, ((0, 0), (0, n_pad - n)))
    x3 = xt.reshape(2, rows, lanes)

    grid = (pl.cdiv(rows, block_rows),)          # last block may be partial

    itemsize = x.dtype.itemsize
    # Working set: double-buffered (input block = 2*R*L, output block = R*L).
    vmem_needed = 2 * (3 * block_rows * lanes * itemsize) + (2 << 20)
    vmem_limit = int(vmem_needed) if vmem_needed > (16 << 20) else None

    in_spec = pl.BlockSpec((2, block_rows, lanes), lambda i: (0, i, 0))
    out_spec = pl.BlockSpec((block_rows, lanes), lambda i: (i, 0))

    out2 = pl.pallas_call(
        _amplitude_kernel,
        out_shape=jax.ShapeDtypeStruct((rows, lanes), dtype),
        grid=grid,
        in_specs=[in_spec],
        out_specs=out_spec,
        compiler_params=pltpu.CompilerParams(
            dimension_semantics=("parallel",),
            vmem_limit_bytes=vmem_limit),
        cost_estimate=pl.CostEstimate(
            flops=4 * n,
            transcendentals=0,
            bytes_accessed=3 * n * itemsize),
    )(x3)

    out = out2.reshape(-1)
    if n_pad != n:                               # un-pad only when we padded
        out = out[:n]
    return out.reshape(out_shape)


def amplitude_ref(x):
    """Pure-JAX reference matching the PyTorch semantics."""
    return jnp.abs(x[..., 0] ** 2 - x[..., 1] ** 2)


if __name__ == "__main__":
    key = jax.random.PRNGKey(0)
    amp = jax.jit(amplitude)

    # NCHW-style spectrogram-like input with a trailing (real, imag) axis.
    x = jax.random.normal(key, (2, 4, 16, 16, 2), dtype=jnp.float32)
    y = amp(x)
    jax.block_until_ready(y)
    assert y.shape == x.shape[:-1], (y.shape, x.shape)
    assert jnp.allclose(y, amplitude_ref(x), atol=1e-6, rtol=1e-6), "mismatch"

    # Multi-step grid + partial (masked) last row-block, no padding needed.
    x2 = jax.random.normal(jax.random.PRNGKey(0), (4, 2, 64, 72, 2),
                           dtype=jnp.float32)
    y2 = amp(x2)
    jax.block_until_ready(y2)
    assert y2.shape == x2.shape[:-1]
    assert jnp.allclose(y2, amplitude_ref(x2), atol=1e-6, rtol=1e-6), "grid mismatch"

    # Ragged-size sanity check (exercises the pad / un-pad fallback path).
    x3 = jax.random.normal(jax.random.PRNGKey(0), (3, 5, 7, 2), dtype=jnp.float32)
    y3 = amp(x3)
    jax.block_until_ready(y3)
    assert y3.shape == x3.shape[:-1]
    assert jnp.allclose(y3, amplitude_ref(x3), atol=1e-6, rtol=1e-6), "ragged mismatch"

    print("KERNEL_OK")
</pallas_src>

<mosaic_0001>
module attributes {stable_mosaic.version = 11 : i64} {
  func.func @_amplitude_kernel(%arg0: i32, %arg1: memref<2x4x512xf32, #tpu.memory_space<vmem>>, %arg2: memref<4x512xf32, #tpu.memory_space<vmem>>) attributes {dimension_semantics = [#tpu.dimension_semantics<parallel>], iteration_bounds = array<i64: 1>, scalar_prefetch = 0 : i64, scratch_operands = 0 : i64, tpu.core_type = #tpu.core_type<tc>, window_params = [{transform_indices = @transform_0, window_bounds = array<i64: 2, 4, 512>}, {transform_indices = @transform_1, window_bounds = array<i64: 4, 512>}]} {
    %c0 = arith.constant 0 : index
    %c0_0 = arith.constant 0 : index
    %c0_1 = arith.constant 0 : index
    %0 = vector.load %arg1[%c0, %c0_0, %c0_1] : memref<2x4x512xf32, #tpu.memory_space<vmem>>, vector<1x4x512xf32>
    %1 = vector.shape_cast %0 : vector<1x4x512xf32> to vector<4x512xf32>
    %c1 = arith.constant 1 : index
    %c0_2 = arith.constant 0 : index
    %c0_3 = arith.constant 0 : index
    %2 = vector.load %arg1[%c1, %c0_2, %c0_3] : memref<2x4x512xf32, #tpu.memory_space<vmem>>, vector<1x4x512xf32>
    %3 = vector.shape_cast %2 : vector<1x4x512xf32> to vector<4x512xf32>
    %4 = arith.mulf %1, %1 : vector<4x512xf32>
    %5 = arith.mulf %3, %3 : vector<4x512xf32>
    %6 = arith.subf %4, %5 : vector<4x512xf32>
    %7 = math.absf %6 : vector<4x512xf32>
    %c0_4 = arith.constant 0 : index
    %c0_5 = arith.constant 0 : index
    %8 = vector.load %arg2[%c0_4, %c0_5] : memref<4x512xf32, #tpu.memory_space<vmem>>, vector<4x512xf32>
    tpu.vector_store %arg2[%c0_4, %c0_5], %7 {strides = array<i32>} : memref<4x512xf32, #tpu.memory_space<vmem>>, vector<4x512xf32>,
    return
  }
  func.func @transform_0(%arg0: i32) -> (i32, i32, i32) {
    %c0_i32 = arith.constant 0 : i32
    %c0_i32_0 = arith.constant 0 : i32
    %c0_i32_1 = arith.constant 0 : i32
    return %c0_i32, %arg0, %c0_i32_0 : i32, i32, i32
  }
  func.func @transform_1(%arg0: i32) -> (i32, i32) {
    %c0_i32 = arith.constant 0 : i32
    %c0_i32_0 = arith.constant 0 : i32
    return %arg0, %c0_i32 : i32, i32
  }
}

</mosaic_0001>

<bundles_post_ra>
// kernel: amplitude.1
= control target key start
LH: loop header
LB: loop body
LE: loop exit
PB: predicated region body
PF: predicated region fallthrough
CT: control target
= control target key end

     0   :  { %s57_s0 = inlined_call_operand.vmem [shape: f32[2,4,512], index: 0, kind: input, shape index: {}]   ;;  %s58_s1 = inlined_call_operand.vmem [shape: f32[4,512], index: 1, kind: output, shape index: {}]  }
   0x1   :  { %v8_v0 = vld [vmem:[%s57_s0] sm:$0xff]  ;;  %v27_v1 = vld [vmem:[%s57_s0 + $0x10] sm:$0xff]  ;;  %v9_v2 = vld [vmem:[%s57_s0 + $0x8] sm:$0xff] }
   0x2   :  { %v13_v3 = vmul.f32 %v8_v0, %v8_v0  ;;  %v15_v4 = vmul.f32 %v27_v1, %v27_v1  ;;  %v28_v5 = vld [vmem:[%s57_s0 + $0x18] sm:$0xff]  ;;  %v14_v6 = vmul.f32 %v9_v2, %v9_v2 }
   0x3   :  { %v16_v7 = vmul.f32 %v28_v5, %v28_v5 }
   0x4   :  { %v17_v8 = vsub.f32 %v13_v3, %v15_v4 }
   0x5   :  { %v18_v9 = vsub.f32 %v14_v6, %v16_v7 }
   0x6   :  { %v19_v10 = vand.u32 2147483647, %v17_v8 }
   0x7   :  { %v20_v11 = vand.u32 2147483647, %v18_v9 }
   0x8   :  { %21 = vst [vmem:[%s58_s1] sm:$0xff] %v19_v10 }
   0x9   :  { %22 = vst [vmem:[%s58_s1 + $0x8] sm:$0xff] %v20_v11 }

</bundles_post_ra>
